<compile_context>
chip_gen: v7x
topology: tpu7x:2x2x1
jax: 0.10.0
libtpu: 0.0.40
codegen_flags: <defaults>
</compile_context>

<pallas_src>
import jax
import jax.numpy as jnp
from jax.experimental import pallas as pl
from jax.experimental.pallas import tpu as pltpu


# --------------------------------------------------------------------------- #
# Kernel
# --------------------------------------------------------------------------- #
def _row_nll_partial(x):
    """Per-row  W*logsumexp(x) - sum(x)  over the last (lane) axis, in f32.

    sum_j (logsumexp(row) - x_j) == W*lse_row - sum_j x_j, i.e. the row's total
    negative-log-softmax.  Max is exact in the input dtype; the upcast to f32
    happens inline inside the exp/sum chains (no standalone full-tile f32 temp).
    """
    w = x.shape[-1]
    m = jnp.max(x, axis=-1, keepdims=True)                         # exact in input dtype
    e = jnp.exp(x.astype(jnp.float32) - m.astype(jnp.float32))     # fused upcast -> EUP
    lse = m.astype(jnp.float32) + jnp.log(jnp.sum(e, axis=-1, keepdims=True))
    row_sum = jnp.sum(x.astype(jnp.float32), axis=-1, keepdims=True)
    return jnp.float32(w) * lse - row_sum


def normalized_loss_kernel(pos_ref, neg_ref, nll_ref):
    # Padded rows of a ragged boundary tile may hold unspecified VMEM data;
    # any inf/NaN partials they produce land only in discarded output rows.
    nll_ref[:, 0:1] = _row_nll_partial(pos_ref[...])   # one store per array
    nll_ref[:, 1:2] = _row_nll_partial(neg_ref[...])


# --------------------------------------------------------------------------- #
# Tiling helpers (generation-aware)
# --------------------------------------------------------------------------- #
def _vmem_capacity_bytes():
    try:
        cap = getattr(pltpu.get_tpu_info(), "vmem_capacity_bytes", None)
        if cap:
            return int(cap)
    except Exception:
        pass
    return 64 * 1024 * 1024        # conservative default: v7x per-TC VMEM


def _sublane_multiple(itemsize):
    # packed sublane granularity: f32 -> 8, bf16 -> 16, int8/fp8 -> 32
    return {4: 8, 2: 16, 1: 32}.get(int(itemsize), 8)


def _pick_tile_rows(batch, row_bytes, sub, vmem_cap):
    """Largest sublane-multiple row tile whose double-buffered blocks fit budget."""
    budget = (vmem_cap * 3) // 8                # ~37.5% of VMEM for input blocks
    tb = budget // (2 * row_bytes)              # 2x: double buffering
    tb = min(tb, 2048)
    if batch > 2 * sub:
        # keep >= 2 grid tiles so the parallel axis can span both v7x TCs
        half = -(-batch // 2)
        tb = min(tb, -(-half // sub) * sub)
    if tb >= batch:
        return batch                            # single full-extent tile (legal)
    return max(sub, (tb // sub) * sub)


# --------------------------------------------------------------------------- #
# Wrapper
# --------------------------------------------------------------------------- #
def normalized_loss(pos_sim, neg_sim, pos_count, neg_count, *, tile_rows=None):
    B, P = pos_sim.shape
    Bn, N = neg_sim.shape
    assert B == Bn, "pos_sim and neg_sim must share the batch dimension"

    isp = jnp.dtype(pos_sim.dtype).itemsize
    isn = jnp.dtype(neg_sim.dtype).itemsize
    row_bytes = P * isp + N * isn
    sub = max(_sublane_multiple(isp), _sublane_multiple(isn))
    vmem_cap = _vmem_capacity_bytes()

    if tile_rows is None:
        tb = _pick_tile_rows(B, row_bytes, sub, vmem_cap)
    else:
        tb = min(int(tile_rows), B)
        if tb < B:
            tb = max(sub, (tb // sub) * sub)
            tb = min(tb, B)                      # degenerate small batch -> full extent
    num_tiles = pl.cdiv(B, tb)

    # Scoped VMEM consistent with the chosen blocks: double-buffered inputs +
    # tiny (tb, 2) f32 output blocks + headroom, capped below physical VMEM.
    tile_bytes = tb * row_bytes + tb * 2 * 4
    vmem_limit = int(min(max(2 * tile_bytes + (2 << 20), 8 << 20),
                         (vmem_cap * 4) // 5))

    nll = pl.pallas_call(
        normalized_loss_kernel,
        grid=(num_tiles,),
        in_specs=[
            pl.BlockSpec((tb, P), lambda i: (i, 0)),
            pl.BlockSpec((tb, N), lambda i: (i, 0)),
        ],
        out_specs=pl.BlockSpec((tb, 2), lambda i: (i, 0)),
        out_shape=jax.ShapeDtypeStruct((B, 2), jnp.float32),   # per-row total NLL
        compiler_params=pltpu.CompilerParams(
            dimension_semantics=("parallel",),
            vmem_limit_bytes=vmem_limit,
        ),
    )(pos_sim, neg_sim)

    pos_loss = jnp.sum(nll[:, 0]) / jnp.float32(B * P)
    neg_loss = jnp.sum(nll[:, 1]) / jnp.float32(B * N)

    pc = jnp.asarray(pos_count, jnp.float32)
    nc = jnp.asarray(neg_count, jnp.float32)
    return pos_loss / pc + neg_loss / nc


# --------------------------------------------------------------------------- #
# Reference & self-test
# --------------------------------------------------------------------------- #
def _reference(pos_sim, neg_sim, pos_count, neg_count):
    pos_loss = jnp.mean(-jax.nn.log_softmax(pos_sim.astype(jnp.float32), axis=1))
    neg_loss = jnp.mean(-jax.nn.log_softmax(neg_sim.astype(jnp.float32), axis=1))
    return pos_loss / pos_count + neg_loss / neg_count


if __name__ == "__main__":
    key = jax.random.PRNGKey(0)
    k1, k2, k3, k4 = jax.random.split(key, 4)

    # Small, tile-friendly shapes: batch=32, 128 positives, 256 negatives.
    B, P, N = 32, 128, 256
    pos_sim = jax.random.normal(k1, (B, P), dtype=jnp.float32)
    neg_sim = jax.random.normal(k2, (B, N), dtype=jnp.float32)
    pos_count, neg_count = 5.0, 16.0
    ref = _reference(pos_sim, neg_sim, pos_count, neg_count)

    # (a) forced small row tile -> exercises the multi-tile pipelined path.
    out = normalized_loss(pos_sim, neg_sim, pos_count, neg_count, tile_rows=8)
    jax.block_until_ready(out)
    assert jnp.allclose(out, ref, rtol=1e-5, atol=1e-5), (out, ref)

    # (b) auto-sized tiles (generation-aware picker; >= 2 tiles for B > 16).
    out_auto = normalized_loss(pos_sim, neg_sim, pos_count, neg_count)
    jax.block_until_ready(out_auto)
    assert jnp.allclose(out_auto, ref, rtol=1e-5, atol=1e-5), (out_auto, ref)

    # (c) ragged batch -> exercises the padded boundary tile.
    B2 = 20
    pos2 = jax.random.normal(k3, (B2, P), dtype=jnp.float32)
    neg2 = jax.random.normal(k4, (B2, N), dtype=jnp.float32)
    out2 = normalized_loss(pos2, neg2, 3.0, 7.0)
    jax.block_until_ready(out2)
    ref2 = _reference(pos2, neg2, 3.0, 7.0)
    assert jnp.allclose(out2, ref2, rtol=1e-5, atol=1e-5), (out2, ref2)

    # (d) bf16 pass-through (inputs stream at half the HBM bytes).
    pos_bf = pos_sim.astype(jnp.bfloat16)
    neg_bf = neg_sim.astype(jnp.bfloat16)
    out_bf = normalized_loss(pos_bf, neg_bf, pos_count, neg_count)
    jax.block_until_ready(out_bf)
    ref_bf = _reference(pos_bf, neg_bf, pos_count, neg_count)
    assert jnp.allclose(out_bf, ref_bf, rtol=5e-3, atol=5e-3), (out_bf, ref_bf)

    print("KERNEL_OK")
</pallas_src>

<mosaic_0001>
module attributes {stable_mosaic.version = 11 : i64} {
  func.func @normalized_loss_kernel(%arg0: i32, %arg1: memref<8x128xf32, #tpu.memory_space<vmem>>, %arg2: memref<8x256xf32, #tpu.memory_space<vmem>>, %arg3: memref<8x2xf32, #tpu.memory_space<vmem>>) attributes {dimension_semantics = [#tpu.dimension_semantics<parallel>], iteration_bounds = array<i64: 4>, scalar_prefetch = 0 : i64, scratch_operands = 0 : i64, tpu.core_type = #tpu.core_type<tc>, window_params = [{transform_indices = @transform_0, window_bounds = array<i64: 8, 128>}, {transform_indices = @transform_1, window_bounds = array<i64: 8, 256>}, {transform_indices = @transform_2, window_bounds = array<i64: 8, 2>}]} {
    %c0 = arith.constant 0 : index
    %c0_0 = arith.constant 0 : index
    %0 = vector.load %arg1[%c0, %c0_0] : memref<8x128xf32, #tpu.memory_space<vmem>>, vector<8x128xf32>
    %cst = arith.constant dense<0xFF800000> : vector<8xf32>
    %1 = vector.multi_reduction <maximumf>, %0, %cst [1] : vector<8x128xf32> to vector<8xf32>
    %2 = vector.shape_cast %1 : vector<8xf32> to vector<8x1xf32>
    %3 = vector.broadcast %2 : vector<8x1xf32> to vector<8x128xf32>
    %4 = arith.subf %0, %3 : vector<8x128xf32>
    %5 = math.exp %4 : vector<8x128xf32>
    %cst_1 = arith.constant dense<0.000000e+00> : vector<8xf32>
    %6 = vector.multi_reduction <add>, %5, %cst_1 [1] : vector<8x128xf32> to vector<8xf32>
    %7 = vector.shape_cast %6 : vector<8xf32> to vector<8x1xf32>
    %8 = math.log %7 : vector<8x1xf32>
    %9 = arith.addf %2, %8 : vector<8x1xf32>
    %cst_2 = arith.constant dense<0.000000e+00> : vector<8xf32>
    %10 = vector.multi_reduction <add>, %0, %cst_2 [1] : vector<8x128xf32> to vector<8xf32>
    %11 = vector.shape_cast %10 : vector<8xf32> to vector<8x1xf32>
    %cst_3 = arith.constant 1.280000e+02 : f32
    %12 = vector.broadcast %cst_3 : f32 to vector<8x1xf32>
    %13 = arith.mulf %12, %9 : vector<8x1xf32>
    %14 = arith.subf %13, %11 : vector<8x1xf32>
    %c0_4 = arith.constant 0 : index
    %c0_5 = arith.constant 0 : index
    %15 = vector.load %arg3[%c0_4, %c0_5] : memref<8x2xf32, #tpu.memory_space<vmem>>, vector<8x1xf32>
    tpu.vector_store %arg3[%c0_4, %c0_5], %14 {strides = array<i32>} : memref<8x2xf32, #tpu.memory_space<vmem>>, vector<8x1xf32>,
    %c0_6 = arith.constant 0 : index
    %c0_7 = arith.constant 0 : index
    %16 = vector.load %arg2[%c0_6, %c0_7] : memref<8x256xf32, #tpu.memory_space<vmem>>, vector<8x256xf32>
    %cst_8 = arith.constant dense<0xFF800000> : vector<8xf32>
    %17 = vector.multi_reduction <maximumf>, %16, %cst_8 [1] : vector<8x256xf32> to vector<8xf32>
    %18 = vector.shape_cast %17 : vector<8xf32> to vector<8x1xf32>
    %19 = vector.broadcast %18 : vector<8x1xf32> to vector<8x256xf32>
    %20 = arith.subf %16, %19 : vector<8x256xf32>
    %21 = math.exp %20 : vector<8x256xf32>
    %cst_9 = arith.constant dense<0.000000e+00> : vector<8xf32>
    %22 = vector.multi_reduction <add>, %21, %cst_9 [1] : vector<8x256xf32> to vector<8xf32>
    %23 = vector.shape_cast %22 : vector<8xf32> to vector<8x1xf32>
    %24 = math.log %23 : vector<8x1xf32>
    %25 = arith.addf %18, %24 : vector<8x1xf32>
    %cst_10 = arith.constant dense<0.000000e+00> : vector<8xf32>
    %26 = vector.multi_reduction <add>, %16, %cst_10 [1] : vector<8x256xf32> to vector<8xf32>
    %27 = vector.shape_cast %26 : vector<8xf32> to vector<8x1xf32>
    %cst_11 = arith.constant 2.560000e+02 : f32
    %28 = vector.broadcast %cst_11 : f32 to vector<8x1xf32>
    %29 = arith.mulf %28, %25 : vector<8x1xf32>
    %30 = arith.subf %29, %27 : vector<8x1xf32>
    %c0_12 = arith.constant 0 : index
    %c1 = arith.constant 1 : index
    %31 = vector.load %arg3[%c0_12, %c1] : memref<8x2xf32, #tpu.memory_space<vmem>>, vector<8x1xf32>
    tpu.vector_store %arg3[%c0_12, %c1], %30 {strides = array<i32>} : memref<8x2xf32, #tpu.memory_space<vmem>>, vector<8x1xf32>,
    return
  }
  func.func @transform_0(%arg0: i32) -> (i32, i32) {
    %c0_i32 = arith.constant 0 : i32
    %c0_i32_0 = arith.constant 0 : i32
    return %arg0, %c0_i32 : i32, i32
  }
  func.func @transform_1(%arg0: i32) -> (i32, i32) {
    %c0_i32 = arith.constant 0 : i32
    %c0_i32_0 = arith.constant 0 : i32
    return %arg0, %c0_i32 : i32, i32
  }
  func.func @transform_2(%arg0: i32) -> (i32, i32) {
    %c0_i32 = arith.constant 0 : i32
    %c0_i32_0 = arith.constant 0 : i32
    return %arg0, %c0_i32 : i32, i32
  }
}

</mosaic_0001>

<bundles_post_ra>
// kernel: tpu_custom_call.1
= control target key start
LH: loop header
LB: loop body
LE: loop exit
PB: predicated region body
PF: predicated region fallthrough
CT: control target
= control target key end

     0   :  { %7 = vsyncpa [#allocation3], 0  ;;  %s660_s0 = inlined_call_operand.hbm [shape: f32[32,128], index: 0, kind: input, shape index: {}]   ;;  %s661_s1 = inlined_call_operand.hbm [shape: f32[32,256], index: 1, kind: input, shape index: {}]   ;;  %s662_s2 = inlined_call_operand.vmem [shape: f32[32,2], index: 2, kind: output, shape index: {}]  }
   0x1   :  { %9 = vsyncpa [#allocation3 + $0x1], 0 }
   0x2   :  { %10 = vsyncpa [#allocation5], 0 }
   0x3   :  { %12 = vsyncpa [#allocation5 + $0x1], 0  ;;  %s512_s9 = smov 0   ;;  %s514_s10 = smov 0  }
   0x4   :  { %s516_s11 = smov 0   ;;  %s518_s12 = smov 0  }
   0x5 LB: > { %s531_s13 = sadd.s32 4294967295, %s493_s12   ;;  %s534_s14 = sadd.s32 1, %s493_s12   ;;  %s493_s12 = sphi %s518_s12, %s674_s12   ;;  %s489_s11 = sphi %s516_s11, %s673_s11   ;;  %s485_s10 = sphi %s514_s10, %s672_s10   ;;  %s481_s9 = sphi %s512_s9, %s671_s9  }
   0x6   : > { %s22_s15 = ssub.s32 %s493_s12, %s534_s14  ;;  %s25_s16 = sadd.s32 1, %s489_s11 }
   0x7   : > { %p23_p0 = scmp.eq.s32.totalorder %s22_s15, 0  ;;  %p32_p1 = scmp.ne.s32.totalorder %s489_s11, %s485_s10 }
   0x8   : > { %p33_p2 = scmp.eq.s32.totalorder %s493_s12, 0  ;;  %p38_p3 = scmp.ne.s32.totalorder %s485_s10, %s481_s9 }
   0x9   : > { %s544_s17 = scalar_select %p23_p0, %s489_s11, %s25_s16  }
   0xa   : > { %p34_p4 = por %p33_p2, %p32_p1  ;;  %p39_p5 = scmp.eq.s32.totalorder %s531_s13, 0 }
   0xb   : > { %p352_p6 = scmp.lt.s32.totalorder %s493_s12, 4  ;;  %s553_s19 = sand.u32 1, %s489_s11  }
   0xc   : > { %p548_p7 = por %p39_p5, %p38_p3  ;;  %s329_s20 = sshll.u32 %s553_s19, 3 }
   0xd   : > { %s330_s21 = sshll.u32 %s493_s12, 7  ;;  %s118_s25 = scalar_lea.vmem [#allocation2], %s329_s20 }
   0xe   : > { %s664_s18 = scalar_select %p548_p7, 1, 0 }
   0xf   : > { %s560_s24 = scalar_lea.hbm %s660_s0, %s330_s21  ;;  %s125_s26 = sshll.u32 %s118_s25, 4  ;;  %s562_s26 = int_to_ptr.vmem [resolvable:$true] %s125_s26 }
  0x10   : > { %p564_p8 = pnand %p352_p6, %p34_p4  ;;  %s115_s28 = scalar_lea.sflag [#allocation3], %s553_s19 }
  0x11   : > { %s395_s29 = scalar_lea.hbm %s560_s24, 128  ;;  %s400_s4 = scalar_lea.hbm %s660_s0, 512 }
  0x12   : > { %p396_p11 = scmp.ne.s32.totalorder %s560_s24, %s395_s29  ;;  %p397_p12 = pneg %p564_p8 }
  0x13   : > { %p401_p1 = scmp.lt.u32.totalorder %s560_s24, %s660_s0  ;;  %p402_p2 = scmp.lt.u32.totalorder %s400_s4, %s395_s29 }
  0x14   : > { %p398_p13 = pnand %p397_p12, %p396_p11  ;;  %p404_p4 = scmp.lt.u32.totalorder %s395_s29, %s560_s24 }
  0x15   : > { %p403_p3 = por %p402_p2, %p401_p1 }
  0x16   : > { %p399_p0 = pneg %p398_p13 }
  0x17   : > { %p405_p5 = por %p404_p4, %p403_p3 }
  0x19   : > { %p406_p6 = pnand %p405_p5, %p399_p0 }
  0x1b   : > { %409 = shalt.err (!%p406_p6)
}
  0x1c   : > { %s410_s7 = scalar_lea.vmem %s562_s26, 128  ;;  %s495_s8 = smov [#allocation2]  }
  0x1d   : > { %p411_p11 = scmp.ne.s32.totalorder %s562_s26, %s410_s7  ;;  %s415_s9 = sshll.u32 %s495_s8, 4  ;;  %s416_s9 = int_to_ptr.vmem [resolvable:$false] %s415_s9 }
  0x1e   : > { %s417_s15 = scalar_lea.vmem %s416_s9, 256  ;;  %p418_p10 = scmp.lt.s32.totalorder %s562_s26, %s416_s9 }
  0x1f   : > { %p413_p13 = pnand %p411_p11, %p397_p12  ;;  %p419_p1 = scmp.lt.s32.totalorder %s417_s15, %s410_s7 }
  0x21   : > { %p414_p9 = pneg %p413_p13  ;;  %p420_p2 = por %p419_p1, %p418_p10 }
  0x23   : > { %p421_p3 = pnand %p420_p2, %p414_p9 }
  0x25   : > { %424 = shalt.err (!%p421_p3)
}
  0x26   : > { %348 = dma.hbm_to_vmem [thread:$0]  (!%p564_p8), %s560_s24, 128, %s562_s26, %s115_s28  }
  0x27   : > { %p666_p0 = scmp.lt.s32.totalorder %s493_s12, 5  ;;  %p667_p4 = scmp.ge.s32.totalorder %s493_s12, 1 }
  0x28   : > { %s331_s20 = sshll.u32 %s553_s19, 4  ;;  %s340_s21 = sshll.u32 %s493_s12, 8 }
  0x29   : > { %p600_p5 = pnand %p667_p4, %p666_p0  ;;  %s609_s25 = scalar_lea.hbm %s661_s1, %s340_s21 }
  0x2a   : > { %s136_s29 = scalar_lea.vmem [#allocation4], %s331_s20  ;;  %s133_s24 = scalar_lea.sflag [#allocation5], %s553_s19 }
  0x2b   : > { %s668_s16 = scalar_select %p600_p5, 1, 0 }
  0x2c   : > { %s144_s30 = sshll.u32 %s136_s29, 4  ;;  %s425_s26 = scalar_lea.hbm %s609_s25, 256  ;;  %s145_s30 = int_to_ptr.vmem [resolvable:$true] %s144_s30 }
  0x2d   : > { %p426_p9 = scmp.ne.s32.totalorder %s609_s25, %s425_s26  ;;  %s430_s3 = scalar_lea.hbm %s661_s1, 1024 }
  0x2e   : > { %p431_p11 = scmp.lt.u32.totalorder %s609_s25, %s661_s1  ;;  %p432_p13 = scmp.lt.u32.totalorder %s430_s3, %s425_s26 }
  0x2f   : > { %p428_p10 = pnand %p426_p9, %p397_p12  ;;  %p434_p2 = scmp.lt.u32.totalorder %s425_s26, %s609_s25 }
  0x30   : > { %p433_p1 = por %p432_p13, %p431_p11 }
  0x31   : > { %p429_p6 = pneg %p428_p10 }
  0x32   : > { %p435_p3 = por %p434_p2, %p433_p1 }
  0x34   : > { %p436_p0 = pnand %p435_p3, %p429_p6 }
  0x36   : > { %439 = shalt.err (!%p436_p0)
}
  0x37   : > { %s440_s19 = scalar_lea.vmem %s145_s30, 256  ;;  %s496_s6 = smov [#allocation4]  }
  0x38   : > { %p441_p4 = scmp.ne.s32.totalorder %s145_s30, %s440_s19  ;;  %s445_s7 = sshll.u32 %s496_s6, 4  ;;  %s446_s7 = int_to_ptr.vmem [resolvable:$false] %s445_s7 }
  0x39   : > { %s447_s8 = scalar_lea.vmem %s446_s7, 512  ;;  %p448_p7 = scmp.lt.s32.totalorder %s145_s30, %s446_s7 }
  0x3a   : > { %p443_p9 = pnand %p441_p4, %p397_p12  ;;  %p449_p5 = scmp.lt.s32.totalorder %s447_s8, %s440_s19 }
  0x3c   : > { %p444_p10 = pneg %p443_p9  ;;  %p450_p11 = por %p449_p5, %p448_p7 }
  0x3e   : > { %p451_p13 = pnand %p450_p11, %p444_p10 }
  0x40   : > { %454 = shalt.err (!%p451_p13)
}
  0x41   : > { %351 = dma.hbm_to_vmem [thread:$0]  (!%p564_p8), %s609_s25, 256, %s145_s30, %s133_s24  }
  0x42   : > { %p669_p6 = scmp.ne.s32.totalorder %s668_s16, 0 }
  0x43   : > { %s155_s9 = sand.u32 (!%p669_p6), 1, %s485_s10   ;;  %p670_p12 = scmp.ne.s32.totalorder (!%p669_p6), %s664_s18, 0 }
  0x44   : > { %153 = sbr.rel (%p669_p6) target bundleno = 409 (0x199), region = 28  ;;  %s335_s15 = sshll.u32 (!%p669_p6), %s155_s9, 3 }
  0x45   : > { %s156_s20 = scalar_lea.sflag (!%p669_p6), [#allocation3], %s155_s9  ;;  %s159_s21 = scalar_lea.vmem (!%p669_p6), [#allocation2], %s335_s15 }
  0x4b   : > { %472 = dma.done.wait (%p670_p12), %s156_s20, 128  }
  0x4c   : > { %474 = vsyncadd (%p670_p12), %s156_s20, 4294967168  ;;  %s336_s22 = sshll.u32 %s155_s9, 4  ;;  %s165_s23 = scalar_lea.sflag [#allocation5], %s155_s9 }
  0x4d   : > { %s168_s27 = scalar_lea.vmem [#allocation4], %s336_s22 }
  0x4e   : > { %476 = dma.done.wait (%p670_p12), %s165_s23, 256  }
  0x4f   : > { %478 = vsyncadd (%p670_p12), %s165_s23, 4294967040  ;;  %v214_v0 = vld [vmem:[%s168_s27] sm:$0xff]  ;;  %v215_v1 = vld [vmem:[%s168_s27 + $0x8] sm:$0xff]  ;;  %p193_p7 = scmp.lt.s32.totalorder %s531_s13, 3  ;;  %vm212_vm0 = vcmask 7168   ;;  %vm236_vm1 = vcmask 15368  }
  0x50   : > { %v216_v2 = vmax.f32 %v214_v0, %v215_v1  ;;  %v197_v3 = vld [vmem:[%s159_s21] sm:$0xff]  ;;  %v231_v16 = vadd.f32 %v215_v1, %v214_v0 }
  0x51   : > { %s676_s13 = smov (!%p193_p7, %s531_s13), 3 }
  0x52   : > { %217 = vmax.xlane.f32.xlu0 %v216_v2  ;;  %s337_s18 = sshll.u32 %s676_s13, 3 }
  0x53   : > { %s196_s29 = scalar_lea.vmem %s662_s2, %s337_s18 }
  0x56   : > { %198 = vmax.xlane.f32.xlu0 %v197_v3 }
  0x5a   : > { %208 = vadd.xlane.f32.xlu0 %v197_v3 }
  0xdf   : > { %v218_v4 = vpop.xlane.xlu0 %217 }
  0xe0   : > { %v219_v5 = vsub.f32 %v214_v0, %v218_v4  ;;  %v220_v6 = vsub.f32 %v215_v1, %v218_v4 }
  0xe2   : > { %v221_v7 = vmul.f32 1.442695, %v219_v5  ;;  %v223_v8 = vmul.f32 1.442695, %v220_v6 }
  0xe3   : > { %v199_v9 = vpop.xlane.xlu0 %198 }
  0xe4   : > { %v200_v10 = vsub.f32 %v197_v3, %v199_v9  ;;  %385 = vpow2.f32 %v221_v7 }
  0xe5   : > { %387 = vpow2.f32 %v223_v8 }
  0xe6   : > { %v201_v11 = vmul.f32 1.442695, %v200_v10 }
  0xe7   : > { %v209_v23 = vpop.xlane.xlu0 %208 }
  0xe8   : > { %389 = vpow2.f32 %v201_v11 }
  0xee   : > { %v386_v12 = vpop.eup %385 }
  0xef   : > { %v388_v13 = vpop.eup %387 }
  0xf0   : > { %v225_v15 = vadd.f32 %v388_v13, %v386_v12 }
  0xf2   : > { %v390_v14 = vpop.eup %389 }
  0xf3   : > { %203 = vadd.xlane.f32.xlu1 %v390_v14 }
  0xf7   : > { %226 = vadd.xlane.f32.xlu1 %v225_v15 }
  0xfb   : > { %232 = vadd.xlane.f32.xlu1 %v231_v16 }
 0x180   : > { %v204_v17 = vpop.xlane.xlu1 %203 }
 0x181   : > { %391 = vlog2.f32 %v204_v17 }
 0x184   : > { %v227_v18 = vpop.xlane.xlu1 %226 }
 0x185   : > { %393 = vlog2.f32 %v227_v18 }
 0x188   : > { %v233_v28 = vpop.xlane.xlu1 %232 }
 0x18b   : > { %v392_v19 = vpop.eup %391 }
 0x18c   : > { %v206_v20 = vmul.f32 0.6931472, %v392_v19 }
 0x18e   : > { %v207_v21 = vadd.f32 %v206_v20, %v199_v9 }
 0x18f   : > { %v394_v22 = vpop.eup %393 }
 0x190   : > { %v229_v24 = vmul.f32 0.6931472, %v394_v22  ;;  %v210_v25 = vmul.f32 128.0, %v207_v21 }
 0x192   : > { %v211_v26 = vsub.f32 %v210_v25, %v209_v23  ;;  %v230_v27 = vadd.f32 %v229_v24, %v218_v4 }
 0x194   : > { %213 = vst.msk [vmem:[%s196_s29] sm:$0xff] %vm212_vm0, %v211_v26  ;;  %v234_v29 = vmul.f32 256.0, %v230_v27 }
 0x196   : > { %v235_v30 = vsub.f32 %v234_v29, %v233_v28 }
 0x198   : > { %237 = vst.msk [vmem:[%s196_s29] sm:$0xff] %vm236_vm1, %v235_v30 }
 0x199 PF: > { %p15_p8 = scmp.ge.s32.totalorder %s534_s14, 6   ;;  %s671_s9 = smov %s485_s10 }
 0x19a   : > { %s672_s10 = smov %s489_s11  ;;  %s673_s11 = smov %s544_s17 }
 0x19b   : > { %s674_s12 = smov %s534_s14  ;;  %17 = sbr.rel (!%p15_p8) target bundleno = 5 (0x5), region = 81 }
 0x1a2   :  { %257 = vsyncpa [#allocation3], 1 }
 0x1a3   :  { %259 = vsyncpa [#allocation3 + $0x1], 1 }
 0x1a4   :  { %260 = vsyncpa [#allocation5], 1 }
 0x1a5   :  { %262 = vsyncpa [#allocation5 + $0x1], 1 }

</bundles_post_ra>
